<compile_context>
chip_gen: v5e
topology: v5e:2x2
jax: 0.10.0
libtpu: 0.0.40
codegen_flags: <defaults>
</compile_context>

<pallas_src>
import functools

import jax
import jax.numpy as jnp
import numpy as np
from jax.experimental import pallas as pl
from jax.experimental.pallas import tpu as pltpu


# --------------------------------------------------------------------------
# helpers
# --------------------------------------------------------------------------
def _round_up(x, m):
    return (x + m - 1) // m * m


def _vmem_capacity_bytes():
    """Per-core VMEM capacity; falls back to the v7x size (the smallest)."""
    try:
        return int(pltpu.get_tpu_info().vmem_capacity_bytes)
    except Exception:
        return 64 * 1024 * 1024


def _const_spec(shape, index_map):
    """BlockSpec for a grid-invariant operand; single-buffered if supported."""
    try:
        return pl.BlockSpec(shape, index_map, pipeline_mode=pl.Buffered(1))
    except Exception:
        return pl.BlockSpec(shape, index_map)


def _pick_tile(total, aligned_fn, footprint_fn, budget):
    """Largest divisor of `total` passing `aligned_fn` whose padded VMEM
    footprint fits `budget`; falls back to the SMALLEST aligned divisor
    (never silently to the full extent unless it is the only choice)."""
    divs = [d for d in range(1, total + 1) if total % d == 0]
    aligned = [d for d in divs if aligned_fn(d)] or divs
    fits = [d for d in aligned if footprint_fn(d) <= budget]
    if fits:
        return max(fits)
    non_full = [d for d in aligned if d != total]
    return min(non_full) if non_full else total


# --------------------------------------------------------------------------
# with_conv=True : Conv2d(C, C, k=3, s=2, p=1)
# --------------------------------------------------------------------------
def _conv3x3s2_kernel(x_ref, w_ref, b_ref, o_ref, acc_ref, *, m):
    # x_ref  : (1, 3, 2, M, C) bf16  dim1 = kh, dim2 = column phase (even/odd)
    #          merged dim index = t*We + j  (output row t, column j within tile)
    # w_ref  : (3, 3, C, C)    bf16  [kh, kw, c_in, c_out]
    # b_ref  : (1, C)          f32
    # o_ref  : (1, M, C)             M = TH*We, We = Wo+1 (last column is junk)
    # acc_ref: (M, C)          f32   VMEM accumulator
    acc_ref[...] = jnp.zeros_like(acc_ref)
    for kh in range(3):
        # kw = 0 (even columns) and kw = 1 (odd columns): aligned operands,
        # one MXU matmul each over the whole row tile.
        acc_ref[...] += (
            jnp.dot(x_ref[0, kh, 0], w_ref[kh, 0],
                    preferred_element_type=jnp.float32)
            + jnp.dot(x_ref[0, kh, 1], w_ref[kh, 1],
                      preferred_element_type=jnp.float32))
        # kw = 2: even columns shifted by one merged row; the dropped last
        # element only feeds the junk output column, so no halo is needed.
        acc_ref[:m - 1, :] += jnp.dot(
            x_ref[0, kh, 0, 1:, :], w_ref[kh, 2],
            preferred_element_type=jnp.float32)
    o_ref[0] = (acc_ref[...] + b_ref[...]).astype(o_ref.dtype)


def downsample_conv(x, w, b, *, compute_dtype=jnp.bfloat16, row_tile=None):
    """Conv2d(C, C, kernel=3, stride=2, padding=1) on an NCHW input.

    NOTE: MXU operands are cast to `compute_dtype` (bf16 by default; pass
    jnp.float32 for a full-precision, slower path).  Accumulation is f32.
    """
    B, C, H, W = x.shape
    Ho = (H - 1) // 2 + 1
    Wo = (W - 1) // 2 + 1
    We = Wo + 1                                 # +1 junk column -> dense stores

    # ---- wrapper-side layout prep (plain XLA) -----------------------------
    xt = jnp.transpose(x, (0, 2, 3, 1))                          # NHWC
    xp = jnp.pad(xt, ((0, 0), (1, 2 * Ho - H), (1, 2 * We - 1 - W), (0, 0)))
    xp = xp.astype(compute_dtype)                                # (B, 2Ho+1, 2We, C)
    # column-phase split -> (B, 2, 2Ho+1, We, C)
    xph = jnp.moveaxis(xp.reshape(B, 2 * Ho + 1, We, 2, C), 3, 1)
    # per-tap-row selection (kh = 0,1,2) and merge (row, col) so each tap is
    # a single contiguous (M, C) matmul operand inside the kernel.
    xk = jnp.stack([xph[:, :, kh:kh + 2 * Ho:2] for kh in range(3)], axis=1)
    xk = xk.reshape(B, 3, 2, Ho * We, C)                         # (B, kh, ph, Ho*We, C)

    wt = jnp.transpose(w, (2, 3, 1, 0)).astype(compute_dtype)    # (3, 3, Ci, Co)
    b2 = b.reshape(1, C).astype(jnp.float32)

    # ---- padding-aware, generation-aware tile sizing ----------------------
    cap = _vmem_capacity_bytes()
    in_isz = jnp.dtype(compute_dtype).itemsize
    out_isz = jnp.dtype(x.dtype).itemsize
    c_lane = _round_up(C, 128)

    def footprint(th):
        m = th * We
        in_blk = 6 * _round_up(m, 16) * c_lane * in_isz          # (1,3,2,m,C)
        out_blk = _round_up(m, 16) * c_lane * out_isz
        acc = _round_up(m, 8) * c_lane * 4
        wgt = 9 * _round_up(C, 16) * c_lane * in_isz
        return 2 * in_blk + 2 * out_blk + acc + wgt + 8 * c_lane * 4

    if row_tile is None:
        TH = _pick_tile(Ho, lambda d: (d * We) % 8 == 0 or d == Ho,
                        footprint, cap // 3)
    else:
        TH = row_tile
    assert Ho % TH == 0
    nH = Ho // TH
    M = TH * We

    kernel = functools.partial(_conv3x3s2_kernel, m=M)
    out = pl.pallas_call(
        kernel,
        out_shape=jax.ShapeDtypeStruct((B, Ho * We, C), x.dtype),
        grid=(B, nH),
        in_specs=[
            pl.BlockSpec((1, 3, 2, M, C), lambda bi, i: (bi, 0, 0, i, 0)),
            _const_spec((3, 3, C, C), lambda bi, i: (0, 0, 0, 0)),
            _const_spec((1, C), lambda bi, i: (0, 0)),
        ],
        out_specs=pl.BlockSpec((1, M, C), lambda bi, i: (bi, i, 0)),
        scratch_shapes=[pltpu.VMEM((M, C), jnp.float32)],
        compiler_params=pltpu.CompilerParams(
            dimension_semantics=("parallel", "parallel"),
            vmem_limit_bytes=min(3 * cap // 4, 128 * 1024 * 1024),
        ),
    )(xk, wt, b2)

    # drop the junk column and return to NCHW
    y = out.reshape(B, Ho, We, C)[:, :, :Wo, :]
    return jnp.transpose(y, (0, 3, 1, 2))


# --------------------------------------------------------------------------
# with_conv=False : avg_pool2d(k=2, s=2)
# --------------------------------------------------------------------------
def _avgpool2x2_kernel(x_ref, p_ref, o_ref, *, w):
    # x_ref : (1, TR, 2W)  row r = (c, out_row) -> [x[c,2i,:], x[c,2i+1,:]]
    # p_ref : (W, Wh)      0.25 column-pairing matrix
    # o_ref : (1, TR, Wh)
    v = x_ref[0]
    s = v[:, :w] + v[:, w:]                      # VPU row pair-sum
    o_ref[0] = jnp.dot(s, p_ref[...],
                       preferred_element_type=jnp.float32).astype(o_ref.dtype)


def downsample_avgpool(x, *, row_tile=None):
    """F.avg_pool2d(kernel=2, stride=2) on an NCHW input."""
    B, C, H, W = x.shape
    Hh, Wh = H // 2, W // 2
    Wc = 2 * Wh
    xc = x[:, :, :2 * Hh, :Wc]                   # crop (no-op for even H, W)
    # free row-major reshape: merged row (c*Hh + i) = [x[c,2i,:], x[c,2i+1,:]]
    xr = xc.reshape(B, C * Hh, 2 * Wc)

    pmat = np.zeros((Wc, Wh), np.float32)
    pmat[2 * np.arange(Wh), np.arange(Wh)] = 0.25
    pmat[2 * np.arange(Wh) + 1, np.arange(Wh)] = 0.25
    pmat = jnp.asarray(pmat, dtype=x.dtype)

    cap = _vmem_capacity_bytes()
    isz = jnp.dtype(x.dtype).itemsize
    total = C * Hh

    def footprint(tr):
        in_blk = _round_up(tr, 8) * _round_up(2 * Wc, 128) * isz
        out_blk = _round_up(tr, 8) * _round_up(Wh, 128) * isz
        pm = _round_up(Wc, 8) * _round_up(Wh, 128) * isz
        return 2 * in_blk + 2 * out_blk + pm

    if row_tile is None:
        TR = _pick_tile(total, lambda d: d % 8 == 0 or d == total,
                        footprint, cap // 3)
    else:
        TR = row_tile
    assert total % TR == 0
    nR = total // TR

    kernel = functools.partial(_avgpool2x2_kernel, w=Wc)
    out = pl.pallas_call(
        kernel,
        out_shape=jax.ShapeDtypeStruct((B, total, Wh), x.dtype),
        grid=(B, nR),
        in_specs=[
            pl.BlockSpec((1, TR, 2 * Wc), lambda bi, i: (bi, i, 0)),
            _const_spec((Wc, Wh), lambda bi, i: (0, 0)),
        ],
        out_specs=pl.BlockSpec((1, TR, Wh), lambda bi, i: (bi, i, 0)),
        compiler_params=pltpu.CompilerParams(
            dimension_semantics=("parallel", "parallel"),
            vmem_limit_bytes=min(3 * cap // 4, 128 * 1024 * 1024),
        ),
    )(xr, pmat)
    return out.reshape(B, C, Hh, Wh)


def downsample(x, with_conv, w=None, b=None):
    """Forward pass of the PyTorch `Downsample` module."""
    if with_conv:
        return downsample_conv(x, w, b)
    return downsample_avgpool(x)


# --------------------------- pure-JAX references ---------------------------
def _ref_conv(x, w, b):
    out = jax.lax.conv_general_dilated(
        x, w, window_strides=(2, 2), padding=((1, 1), (1, 1)),
        dimension_numbers=("NCHW", "OIHW", "NCHW"))
    return out + b[None, :, None, None]


def _ref_avgpool(x):
    B, C, H, W = x.shape
    return x.reshape(B, C, H // 2, 2, W // 2, 2).mean(axis=(3, 5))


if __name__ == "__main__":
    B, C, H, W = 2, 4, 16, 16
    key = jax.random.PRNGKey(0)
    kx, kw, kb, kx2 = jax.random.split(key, 4)

    # bf16-exact test values: the conv kernel feeds the MXU in bf16, so
    # exactly-representable inputs keep the f32 reference comparison tight.
    def bf16_exact(v):
        return v.astype(jnp.bfloat16).astype(jnp.float32)

    x = bf16_exact(jax.random.normal(kx, (B, C, H, W), dtype=jnp.float32))

    # Deterministic parameters (PyTorch Conv2d-style uniform bounds).
    # NOTE: the original module builds nn.Conv2d inside forward() with fresh
    # random weights each call; here the parameters are explicit inputs.
    bound = 1.0 / np.sqrt(C * 3 * 3)
    w = bf16_exact(jax.random.uniform(kw, (C, C, 3, 3), jnp.float32, -bound, bound))
    b = bf16_exact(jax.random.uniform(kb, (C,), jnp.float32, -bound, bound))

    # with_conv=True path
    y_conv = jax.block_until_ready(downsample(x, True, w, b))
    np.testing.assert_allclose(np.asarray(y_conv), np.asarray(_ref_conv(x, w, b)),
                               rtol=1e-3, atol=1e-3)
    assert y_conv.shape == (B, C, H // 2, W // 2)

    # with_conv=False path
    y_pool = jax.block_until_ready(downsample(x, False))
    np.testing.assert_allclose(np.asarray(y_pool), np.asarray(_ref_avgpool(x)),
                               rtol=1e-4, atol=1e-4)
    assert y_pool.shape == (B, C, H // 2, W // 2)

    # Exercise the multi-tile (nH > 1 / nR > 1) grid paths on a larger map.
    x2 = bf16_exact(jax.random.normal(kx2, (1, C, 32, 32), dtype=jnp.float32))
    y2 = jax.block_until_ready(downsample_conv(x2, w, b, row_tile=8))
    np.testing.assert_allclose(np.asarray(y2), np.asarray(_ref_conv(x2, w, b)),
                               rtol=1e-3, atol=1e-3)
    y3 = jax.block_until_ready(downsample_avgpool(x2, row_tile=8))
    np.testing.assert_allclose(np.asarray(y3), np.asarray(_ref_avgpool(x2)),
                               rtol=1e-4, atol=1e-4)

    print("KERNEL_OK")
</pallas_src>

<mosaic_0001>
module attributes {stable_mosaic.version = 11 : i64} {
  func.func @_conv3x3s2_kernel(%arg0: i32, %arg1: i32, %arg2: memref<1x3x2x72x4xbf16, #tpu.memory_space<vmem>>, %arg3: memref<3x3x4x4xbf16, #tpu.memory_space<vmem>>, %arg4: memref<1x4xf32, #tpu.memory_space<vmem>>, %arg5: memref<1x72x4xf32, #tpu.memory_space<vmem>>, %arg6: memref<72x4xf32, #tpu.memory_space<vmem>>) attributes {dimension_semantics = [#tpu.dimension_semantics<parallel>, #tpu.dimension_semantics<parallel>], iteration_bounds = array<i64: 2, 1>, scalar_prefetch = 0 : i64, scratch_operands = 1 : i64, tpu.core_type = #tpu.core_type<tc>, window_params = [{transform_indices = @transform_0, window_bounds = array<i64: 1, 3, 2, 72, 4>}, {pipeline_mode = #tpu.pipeline_mode<synchronous>, transform_indices = @transform_1, window_bounds = array<i64: 3, 3, 4, 4>}, {pipeline_mode = #tpu.pipeline_mode<synchronous>, transform_indices = @transform_2, window_bounds = array<i64: 1, 4>}, {transform_indices = @transform_3, window_bounds = array<i64: 1, 72, 4>}]} {
    %cst = arith.constant 0.000000e+00 : f32
    %0 = vector.broadcast %cst : f32 to vector<72x4xf32>
    %c0 = arith.constant 0 : index
    %c0_0 = arith.constant 0 : index
    %1 = vector.load %arg6[%c0, %c0_0] : memref<72x4xf32, #tpu.memory_space<vmem>>, vector<72x4xf32>
    tpu.vector_store %arg6[%c0, %c0_0], %0 {strides = array<i32>} : memref<72x4xf32, #tpu.memory_space<vmem>>, vector<72x4xf32>,
    %c0_1 = arith.constant 0 : index
    %c0_2 = arith.constant 0 : index
    %2 = vector.load %arg6[%c0_1, %c0_2] : memref<72x4xf32, #tpu.memory_space<vmem>>, vector<72x4xf32>
    %c0_3 = arith.constant 0 : index
    %c0_4 = arith.constant 0 : index
    %c0_5 = arith.constant 0 : index
    %c0_6 = arith.constant 0 : index
    %c0_7 = arith.constant 0 : index
    %3 = vector.load %arg2[%c0_3, %c0_4, %c0_5, %c0_6, %c0_7] : memref<1x3x2x72x4xbf16, #tpu.memory_space<vmem>>, vector<1x1x1x72x4xbf16>
    %4 = vector.shape_cast %3 : vector<1x1x1x72x4xbf16> to vector<72x4xbf16>
    %c0_8 = arith.constant 0 : index
    %c0_9 = arith.constant 0 : index
    %c0_10 = arith.constant 0 : index
    %c0_11 = arith.constant 0 : index
    %5 = vector.load %arg3[%c0_8, %c0_9, %c0_10, %c0_11] : memref<3x3x4x4xbf16, #tpu.memory_space<vmem>>, vector<1x1x4x4xbf16>
    %6 = vector.shape_cast %5 : vector<1x1x4x4xbf16> to vector<4x4xbf16>
    %cst_12 = arith.constant dense<0.000000e+00> : vector<72x4xf32>
    %7 = tpu.matmul %4, %6, %cst_12 {dimension_numbers = #tpu.dot_dimension_numbers<[1], [0], [0], [1], [0, 0, 1, 1], [], []>} : vector<72x4xbf16>, vector<4x4xbf16>, vector<72x4xf32> -> vector<72x4xf32>
    %c0_13 = arith.constant 0 : index
    %c0_14 = arith.constant 0 : index
    %c1 = arith.constant 1 : index
    %c0_15 = arith.constant 0 : index
    %c0_16 = arith.constant 0 : index
    %8 = vector.load %arg2[%c0_13, %c0_14, %c1, %c0_15, %c0_16] : memref<1x3x2x72x4xbf16, #tpu.memory_space<vmem>>, vector<1x1x1x72x4xbf16>
    %9 = vector.shape_cast %8 : vector<1x1x1x72x4xbf16> to vector<72x4xbf16>
    %c0_17 = arith.constant 0 : index
    %c1_18 = arith.constant 1 : index
    %c0_19 = arith.constant 0 : index
    %c0_20 = arith.constant 0 : index
    %10 = vector.load %arg3[%c0_17, %c1_18, %c0_19, %c0_20] : memref<3x3x4x4xbf16, #tpu.memory_space<vmem>>, vector<1x1x4x4xbf16>
    %11 = vector.shape_cast %10 : vector<1x1x4x4xbf16> to vector<4x4xbf16>
    %cst_21 = arith.constant dense<0.000000e+00> : vector<72x4xf32>
    %12 = tpu.matmul %9, %11, %cst_21 {dimension_numbers = #tpu.dot_dimension_numbers<[1], [0], [0], [1], [0, 0, 1, 1], [], []>} : vector<72x4xbf16>, vector<4x4xbf16>, vector<72x4xf32> -> vector<72x4xf32>
    %13 = arith.addf %7, %12 : vector<72x4xf32>
    %14 = arith.addf %2, %13 : vector<72x4xf32>
    %c0_22 = arith.constant 0 : index
    %c0_23 = arith.constant 0 : index
    %15 = vector.load %arg6[%c0_22, %c0_23] : memref<72x4xf32, #tpu.memory_space<vmem>>, vector<72x4xf32>
    tpu.vector_store %arg6[%c0_22, %c0_23], %14 {strides = array<i32>} : memref<72x4xf32, #tpu.memory_space<vmem>>, vector<72x4xf32>,
    %c0_24 = arith.constant 0 : index
    %c0_25 = arith.constant 0 : index
    %16 = vector.load %arg6[%c0_24, %c0_25] : memref<72x4xf32, #tpu.memory_space<vmem>>, vector<71x4xf32>
    %c0_26 = arith.constant 0 : index
    %c0_27 = arith.constant 0 : index
    %c0_28 = arith.constant 0 : index
    %c1_29 = arith.constant 1 : index
    %c0_30 = arith.constant 0 : index
    %17 = vector.load %arg2[%c0_26, %c0_27, %c0_28, %c1_29, %c0_30] : memref<1x3x2x72x4xbf16, #tpu.memory_space<vmem>>, vector<1x1x1x71x4xbf16>
    %18 = vector.shape_cast %17 : vector<1x1x1x71x4xbf16> to vector<71x4xbf16>
    %c0_31 = arith.constant 0 : index
    %c2 = arith.constant 2 : index
    %c0_32 = arith.constant 0 : index
    %c0_33 = arith.constant 0 : index
    %19 = vector.load %arg3[%c0_31, %c2, %c0_32, %c0_33] : memref<3x3x4x4xbf16, #tpu.memory_space<vmem>>, vector<1x1x4x4xbf16>
    %20 = vector.shape_cast %19 : vector<1x1x4x4xbf16> to vector<4x4xbf16>
    %cst_34 = arith.constant dense<0.000000e+00> : vector<71x4xf32>
    %21 = tpu.matmul %18, %20, %cst_34 {dimension_numbers = #tpu.dot_dimension_numbers<[1], [0], [0], [1], [0, 0, 1, 1], [], []>} : vector<71x4xbf16>, vector<4x4xbf16>, vector<71x4xf32> -> vector<71x4xf32>
    %22 = arith.addf %16, %21 : vector<71x4xf32>
    %c0_35 = arith.constant 0 : index
    %c0_36 = arith.constant 0 : index
    %23 = vector.load %arg6[%c0_35, %c0_36] : memref<72x4xf32, #tpu.memory_space<vmem>>, vector<71x4xf32>
    tpu.vector_store %arg6[%c0_35, %c0_36], %22 {strides = array<i32>} : memref<72x4xf32, #tpu.memory_space<vmem>>, vector<71x4xf32>,
    %c0_37 = arith.constant 0 : index
    %c0_38 = arith.constant 0 : index
    %24 = vector.load %arg6[%c0_37, %c0_38] : memref<72x4xf32, #tpu.memory_space<vmem>>, vector<72x4xf32>
    %c0_39 = arith.constant 0 : index
    %c1_40 = arith.constant 1 : index
    %c0_41 = arith.constant 0 : index
    %c0_42 = arith.constant 0 : index
    %c0_43 = arith.constant 0 : index
    %25 = vector.load %arg2[%c0_39, %c1_40, %c0_41, %c0_42, %c0_43] : memref<1x3x2x72x4xbf16, #tpu.memory_space<vmem>>, vector<1x1x1x72x4xbf16>
    %26 = vector.shape_cast %25 : vector<1x1x1x72x4xbf16> to vector<72x4xbf16>
    %c1_44 = arith.constant 1 : index
    %c0_45 = arith.constant 0 : index
    %c0_46 = arith.constant 0 : index
    %c0_47 = arith.constant 0 : index
    %27 = vector.load %arg3[%c1_44, %c0_45, %c0_46, %c0_47] : memref<3x3x4x4xbf16, #tpu.memory_space<vmem>>, vector<1x1x4x4xbf16>
    %28 = vector.shape_cast %27 : vector<1x1x4x4xbf16> to vector<4x4xbf16>
    %cst_48 = arith.constant dense<0.000000e+00> : vector<72x4xf32>
    %29 = tpu.matmul %26, %28, %cst_48 {dimension_numbers = #tpu.dot_dimension_numbers<[1], [0], [0], [1], [0, 0, 1, 1], [], []>} : vector<72x4xbf16>, vector<4x4xbf16>, vector<72x4xf32> -> vector<72x4xf32>
    %c0_49 = arith.constant 0 : index
    %c1_50 = arith.constant 1 : index
    %c1_51 = arith.constant 1 : index
    %c0_52 = arith.constant 0 : index
    %c0_53 = arith.constant 0 : index
    %30 = vector.load %arg2[%c0_49, %c1_50, %c1_51, %c0_52, %c0_53] : memref<1x3x2x72x4xbf16, #tpu.memory_space<vmem>>, vector<1x1x1x72x4xbf16>
    %31 = vector.shape_cast %30 : vector<1x1x1x72x4xbf16> to vector<72x4xbf16>
    %c1_54 = arith.constant 1 : index
    %c1_55 = arith.constant 1 : index
    %c0_56 = arith.constant 0 : index
    %c0_57 = arith.constant 0 : index
    %32 = vector.load %arg3[%c1_54, %c1_55, %c0_56, %c0_57] : memref<3x3x4x4xbf16, #tpu.memory_space<vmem>>, vector<1x1x4x4xbf16>
    %33 = vector.shape_cast %32 : vector<1x1x4x4xbf16> to vector<4x4xbf16>
    %cst_58 = arith.constant dense<0.000000e+00> : vector<72x4xf32>
    %34 = tpu.matmul %31, %33, %cst_58 {dimension_numbers = #tpu.dot_dimension_numbers<[1], [0], [0], [1], [0, 0, 1, 1], [], []>} : vector<72x4xbf16>, vector<4x4xbf16>, vector<72x4xf32> -> vector<72x4xf32>
    %35 = arith.addf %29, %34 : vector<72x4xf32>
    %36 = arith.addf %24, %35 : vector<72x4xf32>
    %c0_59 = arith.constant 0 : index
    %c0_60 = arith.constant 0 : index
    %37 = vector.load %arg6[%c0_59, %c0_60] : memref<72x4xf32, #tpu.memory_space<vmem>>, vector<72x4xf32>
    tpu.vector_store %arg6[%c0_59, %c0_60], %36 {strides = array<i32>} : memref<72x4xf32, #tpu.memory_space<vmem>>, vector<72x4xf32>,
    %c0_61 = arith.constant 0 : index
    %c0_62 = arith.constant 0 : index
    %38 = vector.load %arg6[%c0_61, %c0_62] : memref<72x4xf32, #tpu.memory_space<vmem>>, vector<71x4xf32>
    %c0_63 = arith.constant 0 : index
    %c1_64 = arith.constant 1 : index
    %c0_65 = arith.constant 0 : index
    %c1_66 = arith.constant 1 : index
    %c0_67 = arith.constant 0 : index
    %39 = vector.load %arg2[%c0_63, %c1_64, %c0_65, %c1_66, %c0_67] : memref<1x3x2x72x4xbf16, #tpu.memory_space<vmem>>, vector<1x1x1x71x4xbf16>
    %40 = vector.shape_cast %39 : vector<1x1x1x71x4xbf16> to vector<71x4xbf16>
    %c1_68 = arith.constant 1 : index
    %c2_69 = arith.constant 2 : index
    %c0_70 = arith.constant 0 : index
    %c0_71 = arith.constant 0 : index
    %41 = vector.load %arg3[%c1_68, %c2_69, %c0_70, %c0_71] : memref<3x3x4x4xbf16, #tpu.memory_space<vmem>>, vector<1x1x4x4xbf16>
    %42 = vector.shape_cast %41 : vector<1x1x4x4xbf16> to vector<4x4xbf16>
    %cst_72 = arith.constant dense<0.000000e+00> : vector<71x4xf32>
    %43 = tpu.matmul %40, %42, %cst_72 {dimension_numbers = #tpu.dot_dimension_numbers<[1], [0], [0], [1], [0, 0, 1, 1], [], []>} : vector<71x4xbf16>, vector<4x4xbf16>, vector<71x4xf32> -> vector<71x4xf32>
    %44 = arith.addf %38, %43 : vector<71x4xf32>
    %c0_73 = arith.constant 0 : index
    %c0_74 = arith.constant 0 : index
    %45 = vector.load %arg6[%c0_73, %c0_74] : memref<72x4xf32, #tpu.memory_space<vmem>>, vector<71x4xf32>
    tpu.vector_store %arg6[%c0_73, %c0_74], %44 {strides = array<i32>} : memref<72x4xf32, #tpu.memory_space<vmem>>, vector<71x4xf32>,
    %c0_75 = arith.constant 0 : index
    %c0_76 = arith.constant 0 : index
    %46 = vector.load %arg6[%c0_75, %c0_76] : memref<72x4xf32, #tpu.memory_space<vmem>>, vector<72x4xf32>
    %c0_77 = arith.constant 0 : index
    %c2_78 = arith.constant 2 : index
    %c0_79 = arith.constant 0 : index
    %c0_80 = arith.constant 0 : index
    %c0_81 = arith.constant 0 : index
    %47 = vector.load %arg2[%c0_77, %c2_78, %c0_79, %c0_80, %c0_81] : memref<1x3x2x72x4xbf16, #tpu.memory_space<vmem>>, vector<1x1x1x72x4xbf16>
    %48 = vector.shape_cast %47 : vector<1x1x1x72x4xbf16> to vector<72x4xbf16>
    %c2_82 = arith.constant 2 : index
    %c0_83 = arith.constant 0 : index
    %c0_84 = arith.constant 0 : index
    %c0_85 = arith.constant 0 : index
    %49 = vector.load %arg3[%c2_82, %c0_83, %c0_84, %c0_85] : memref<3x3x4x4xbf16, #tpu.memory_space<vmem>>, vector<1x1x4x4xbf16>
    %50 = vector.shape_cast %49 : vector<1x1x4x4xbf16> to vector<4x4xbf16>
    %cst_86 = arith.constant dense<0.000000e+00> : vector<72x4xf32>
    %51 = tpu.matmul %48, %50, %cst_86 {dimension_numbers = #tpu.dot_dimension_numbers<[1], [0], [0], [1], [0, 0, 1, 1], [], []>} : vector<72x4xbf16>, vector<4x4xbf16>, vector<72x4xf32> -> vector<72x4xf32>
    %c0_87 = arith.constant 0 : index
    %c2_88 = arith.constant 2 : index
    %c1_89 = arith.constant 1 : index
    %c0_90 = arith.constant 0 : index
    %c0_91 = arith.constant 0 : index
    %52 = vector.load %arg2[%c0_87, %c2_88, %c1_89, %c0_90, %c0_91] : memref<1x3x2x72x4xbf16, #tpu.memory_space<vmem>>, vector<1x1x1x72x4xbf16>
    %53 = vector.shape_cast %52 : vector<1x1x1x72x4xbf16> to vector<72x4xbf16>
    %c2_92 = arith.constant 2 : index
    %c1_93 = arith.constant 1 : index
    %c0_94 = arith.constant 0 : index
    %c0_95 = arith.constant 0 : index
    %54 = vector.load %arg3[%c2_92, %c1_93, %c0_94, %c0_95] : memref<3x3x4x4xbf16, #tpu.memory_space<vmem>>, vector<1x1x4x4xbf16>
    %55 = vector.shape_cast %54 : vector<1x1x4x4xbf16> to vector<4x4xbf16>
    %cst_96 = arith.constant dense<0.000000e+00> : vector<72x4xf32>
    %56 = tpu.matmul %53, %55, %cst_96 {dimension_numbers = #tpu.dot_dimension_numbers<[1], [0], [0], [1], [0, 0, 1, 1], [], []>} : vector<72x4xbf16>, vector<4x4xbf16>, vector<72x4xf32> -> vector<72x4xf32>
    %57 = arith.addf %51, %56 : vector<72x4xf32>
    %58 = arith.addf %46, %57 : vector<72x4xf32>
    %c0_97 = arith.constant 0 : index
    %c0_98 = arith.constant 0 : index
    %59 = vector.load %arg6[%c0_97, %c0_98] : memref<72x4xf32, #tpu.memory_space<vmem>>, vector<72x4xf32>
    tpu.vector_store %arg6[%c0_97, %c0_98], %58 {strides = array<i32>} : memref<72x4xf32, #tpu.memory_space<vmem>>, vector<72x4xf32>,
    %c0_99 = arith.constant 0 : index
    %c0_100 = arith.constant 0 : index
    %60 = vector.load %arg6[%c0_99, %c0_100] : memref<72x4xf32, #tpu.memory_space<vmem>>, vector<71x4xf32>
    %c0_101 = arith.constant 0 : index
    %c2_102 = arith.constant 2 : index
    %c0_103 = arith.constant 0 : index
    %c1_104 = arith.constant 1 : index
    %c0_105 = arith.constant 0 : index
    %61 = vector.load %arg2[%c0_101, %c2_102, %c0_103, %c1_104, %c0_105] : memref<1x3x2x72x4xbf16, #tpu.memory_space<vmem>>, vector<1x1x1x71x4xbf16>
    %62 = vector.shape_cast %61 : vector<1x1x1x71x4xbf16> to vector<71x4xbf16>
    %c2_106 = arith.constant 2 : index
    %c2_107 = arith.constant 2 : index
    %c0_108 = arith.constant 0 : index
    %c0_109 = arith.constant 0 : index
    %63 = vector.load %arg3[%c2_106, %c2_107, %c0_108, %c0_109] : memref<3x3x4x4xbf16, #tpu.memory_space<vmem>>, vector<1x1x4x4xbf16>
    %64 = vector.shape_cast %63 : vector<1x1x4x4xbf16> to vector<4x4xbf16>
    %cst_110 = arith.constant dense<0.000000e+00> : vector<71x4xf32>
    %65 = tpu.matmul %62, %64, %cst_110 {dimension_numbers = #tpu.dot_dimension_numbers<[1], [0], [0], [1], [0, 0, 1, 1], [], []>} : vector<71x4xbf16>, vector<4x4xbf16>, vector<71x4xf32> -> vector<71x4xf32>
    %66 = arith.addf %60, %65 : vector<71x4xf32>
    %c0_111 = arith.constant 0 : index
    %c0_112 = arith.constant 0 : index
    %67 = vector.load %arg6[%c0_111, %c0_112] : memref<72x4xf32, #tpu.memory_space<vmem>>, vector<71x4xf32>
    tpu.vector_store %arg6[%c0_111, %c0_112], %66 {strides = array<i32>} : memref<72x4xf32, #tpu.memory_space<vmem>>, vector<71x4xf32>,
    %c0_113 = arith.constant 0 : index
    %c0_114 = arith.constant 0 : index
    %68 = vector.load %arg6[%c0_113, %c0_114] : memref<72x4xf32, #tpu.memory_space<vmem>>, vector<72x4xf32>
    %c0_115 = arith.constant 0 : index
    %c0_116 = arith.constant 0 : index
    %69 = vector.load %arg4[%c0_115, %c0_116] : memref<1x4xf32, #tpu.memory_space<vmem>>, vector<1x4xf32>
    %70 = vector.broadcast %69 : vector<1x4xf32> to vector<72x4xf32>
    %71 = arith.addf %68, %70 : vector<72x4xf32>
    %c0_117 = arith.constant 0 : index
    %c0_118 = arith.constant 0 : index
    %c0_119 = arith.constant 0 : index
    %72 = vector.load %arg5[%c0_117, %c0_118, %c0_119] : memref<1x72x4xf32, #tpu.memory_space<vmem>>, vector<1x72x4xf32>
    %73 = vector.shape_cast %72 : vector<1x72x4xf32> to vector<72x4xf32>
    %74 = vector.shape_cast %71 : vector<72x4xf32> to vector<1x72x4xf32>
    tpu.vector_store %arg5[%c0_117, %c0_118, %c0_119], %74 {strides = array<i32>} : memref<1x72x4xf32, #tpu.memory_space<vmem>>, vector<1x72x4xf32>,
    return
  }
  func.func @transform_0(%arg0: i32, %arg1: i32) -> (i32, i32, i32, i32, i32) {
    %c0_i32 = arith.constant 0 : i32
    %c0_i32_0 = arith.constant 0 : i32
    %c0_i32_1 = arith.constant 0 : i32
    %c0_i32_2 = arith.constant 0 : i32
    return %arg0, %c0_i32, %c0_i32_0, %arg1, %c0_i32_1 : i32, i32, i32, i32, i32
  }
  func.func @transform_1(%arg0: i32, %arg1: i32) -> (i32, i32, i32, i32) {
    %c0_i32 = arith.constant 0 : i32
    %c0_i32_0 = arith.constant 0 : i32
    %c0_i32_1 = arith.constant 0 : i32
    %c0_i32_2 = arith.constant 0 : i32
    %c0_i32_3 = arith.constant 0 : i32
    return %c0_i32, %c0_i32_0, %c0_i32_1, %c0_i32_2 : i32, i32, i32, i32
  }
  func.func @transform_2(%arg0: i32, %arg1: i32) -> (i32, i32) {
    %c0_i32 = arith.constant 0 : i32
    %c0_i32_0 = arith.constant 0 : i32
    %c0_i32_1 = arith.constant 0 : i32
    return %c0_i32, %c0_i32_0 : i32, i32
  }
  func.func @transform_3(%arg0: i32, %arg1: i32) -> (i32, i32, i32) {
    %c0_i32 = arith.constant 0 : i32
    %c0_i32_0 = arith.constant 0 : i32
    return %arg0, %arg1, %c0_i32 : i32, i32, i32
  }
}

</mosaic_0001>

<bundles_post_ra>
// kernel: tpu_custom_call.1
= control target key start
LH: loop header
LB: loop body
LE: loop exit
PB: predicated region body
PF: predicated region fallthrough
CT: control target
= control target key end

     0   :  { %s1771_s12 = smov 0   ;;  %s1773_s13 = smov 0   ;;  %s2072_s0 = inlined_call_operand.vmem [shape: bf16[2,3,2,72,4], index: 0, kind: input, shape index: {}]   ;;  %s2073_s1 = inlined_call_operand.vmem [shape: bf16[3,3,4,4], index: 1, kind: input, shape index: {}]   ;;  %s2074_s2 = inlined_call_operand.vmem [shape: f32[1,4], index: 2, kind: input, shape index: {}]   ;;  %s2075_s3 = inlined_call_operand.vmem [shape: f32[2,72,4], index: 3, kind: output, shape index: {}]  }
   0x1   :  { %s1775_s14 = smov 0  }
   0x2 LB: > { %s25_s15 = sadd.s32 1, %s1744_s13  ;;  %p1394_p0 = scmp.ge.s32.totalorder %s1748_s14, 1  ;;  %s1748_s14 = sphi %s1775_s14, %s13_s14   ;;  %s1744_s13 = sphi %s1773_s13, %s2077_s13   ;;  %s1740_s12 = sphi %s1771_s12, %s2076_s12  }
   0x3   : > { %p27_p1 = scmp.ge.s32.totalorder %s25_s15, 2  ;;  %p158_p2 = scmp.lt.s32.totalorder %s1748_s14, 3 }
   0x5   : > { %s2079_s15 = smov (%p27_p1, %s25_s15), 0  ;;  %p159_p3 = pnand %p1394_p0, %p158_p2 }
   0x6   : > { %p191_p4 = scmp.lt.s32.totalorder (!%p159_p3), %s1740_s12, 1 }
   0x7   : > { %162 = sbr.rel (%p159_p3) target bundleno = 353 (0x161), region = 32 }
   0xc   : > { %v1406_v0 = vld [vmem:[%s2073_s1 + $0x2] sm:$0x3]  ;;  %vm290_vm0 = vcmask 1041408   ;;  %v1449_v2 = vld [vmem:[%s2073_s1 + $0x4] sm:$0x3]  ;;  %s2081_s12 = smov (!%p191_p4, %s1740_s12), 1 }
   0xd   : > { %v292_v1 = vsel %vm290_vm0, %v1406_v0, 0  ;;  %v239_v3 = vld [vmem:[%s2073_s1] sm:$0x3]  ;;  %v518_v4 = vsel %vm290_vm0, %v1449_v2, 0  ;;  %v1490_v6 = vld [vmem:[%s2073_s1 + $0x8] sm:$0x3] }
   0xe   : > { %1695 = vmatpush.bf16.msra.mxu1 %v292_v1  ;;  %1696 = vmatpush.bf16.msra.mxu2 %v292_v1  ;;  %v366_v5 = vsel %vm290_vm0, %v239_v3, 0  ;;  %v644_v7 = vsel %vm290_vm0, %v1490_v6, 0  ;;  %v1480_v8 = vld [vmem:[%s2073_s1 + $0x6] sm:$0x3]  ;;  %s1698_s26 = smul.u32 216, %s2081_s12  ;;  %vm211_vm1 = vcmask 31744  }
   0xf   : > { %1697 = vmatpush.bf16.msra.mxu3 %v292_v1  ;;  %301 = vmatpush.bf16.msra.mxu0 %v292_v1  ;;  %v718_v9 = vsel %vm290_vm0, %v1480_v8, 0  ;;  %v1542_v10 = vld [vmem:[%s2073_s1 + $0xa] sm:$0x3]  ;;  %v1583_v18 = vld [vmem:[%s2073_s1 + $0xe] sm:$0x3]  ;;  %vm570_vm3 = vcmask 30720  }
  0x10   : > { %s1818_s4 = scalar_lea.vmem %s2072_s0, %s1698_s26  ;;  %v869_v14 = vsel %vm290_vm0, %v1542_v10, 0  ;;  %v994_v19 = vsel %vm290_vm0, %v1583_v18, 0  ;;  %v1573_v20 = vld [vmem:[%s2073_s1 + $0xc] sm:$0x3]  ;;  %v1635_v27 = vld [vmem:[%s2073_s1 + $0x10] sm:$0x3] }
  0x11   : > { %v1664_v11 = vld [vmem:[%s1818_s4 + $0x2c] sm:$0xff]  ;;  %v1665_v12 = vld [vmem:[%s1818_s4 + $0x34] sm:$0xff]  ;;  %v1405_v13 = vld [vmem:[%s1818_s4 + $0x44] sm:$0xf]  ;;  %v1068_v21 = vsel %vm290_vm0, %v1573_v20, 0  ;;  %v1219_v30 = vsel %vm290_vm0, %v1635_v27, 0 }
  0x12   : > { %527 = vmatpush.bf16.msrb.mxu2 %v518_v4  ;;  %375 = vmatpush.bf16.msrb.mxu1 %v366_v5  ;;  %v269_v15 = vunpack.c.l.b16 %v1405_v13  ;;  %v1663_v16 = vld [vmem:[%s1818_s4 + $0x24] sm:$0xff]  ;;  %v1666_v22 = vld [vmem:[%s1818_s4 + $0x3c] sm:$0xff]  ;;  %v1675_v26 = vld [vmem:[%s1818_s4 + $0x6c] sm:$0xff]  ;;  %vm462_vm2 = vsmask.f32 7424  ;;  %s1699_s11 = smul.u32 72, %s2081_s12 }
  0x13   : > { %653 = vmatpush.bf16.msrb.mxu3 %v644_v7  ;;  %727 = vmatpush.bf16.msrb.mxu0 %v718_v9  ;;  %v1659_v23 = vld [vmem:[%s1818_s4] sm:$0xff]  ;;  %v1671_v24 = vld [vmem:[%s1818_s4 + $0x48] sm:$0xff]  ;;  %v1672_v38 = vld [vmem:[%s1818_s4 + $0x50] sm:$0xff] }
  0x14   : > { %1424 = vmatmul.msk.bf16.vlgmr.msra.gmra.mxu1 %vm211_vm1, %v1664_v11  ;;  %1425 = vmatmul.msk.bf16.vlgmr.msra.gmra.mxu2 %vm211_vm1, %v1665_v12  ;;  %v274_v17 = vpack.c.b16 %v269_v15, %v269_v15  ;;  %v1667_v25 = vld [vmem:[%s1818_s4] sm:$0xff]  ;;  %v1668_v28 = vld [vmem:[%s1818_s4 + $0x8] sm:$0xff]  ;;  %v1676_v39 = vld [vmem:[%s1818_s4 + $0x74] sm:$0xff]  ;;  %s2010_s12 = scalar_lea.vmem %s2075_s3, %s1699_s11 }
  0x15   : > { %1423 = vmatmul.msk.bf16.vlgmr.msra.gmra.mxu0 %vm211_vm1, %v1663_v16  ;;  %v466_v29 = vshll.u32 %v1667_v25, 16  ;;  %v464_v31 = vshrl.u32 %v1667_v25, 16  ;;  %v471_v33 = vshll.u32 %v1668_v28, 16  ;;  %v1660_v36 = vld [vmem:[%s1818_s4 + $0x8] sm:$0xff]  ;;  %v1669_v40 = vld [vmem:[%s1818_s4 + $0x10] sm:$0xff]  ;;  %v475_v41 = vshrl.u32 %v1668_v28, 16 }
  0x16   : > { %878 = vmatpush.bf16.msra.mxu1 %v869_v14  ;;  %1427 = vmatmul.msk.bf16.vlgmr.msra.gmra.mxu3 %vm211_vm1, %v274_v17  ;;  %v479_v42 = vshll.u32 %v1669_v40, 16  ;;  %v1661_v45 = vld [vmem:[%s1818_s4 + $0x10] sm:$0xff]  ;;  %v1673_v47 = vld [vmem:[%s1818_s4 + $0x58] sm:$0xff]  ;;  %v483_v50 = vshrl.u32 %v1669_v40, 16  ;;  %v436_v54 = vld [vmem:[%s1818_s4 + $0x20] sm:$0xf] }
  0x17   : > { %1003 = vmatpush.bf16.msra.mxu2 %v994_v19  ;;  %1077 = vmatpush.bf16.msra.mxu3 %v1068_v21  ;;  %v468_v32 = vrot.slane %v466_v29, 1  ;;  %v473_v35 = vrot.slane %v471_v33, 1  ;;  %v1677_v48 = vld [vmem:[%s1818_s4 + $0x7c] sm:$0xff]  ;;  %v456_v58 = vunpack.c.l.b16 %v436_v54  ;;  %v1678_v59 = vld [vmem:[%s1818_s4 + $0x84] sm:$0xff]  ;;  %v1489_v2 = vld [vmem:[%s1818_s4 + $0x8c] sm:$0xf] }
  0x18   : > { %1228 = vmatpush.bf16.msra.mxu0 %v1219_v30  ;;  %v481_v44 = vrot.slane %v479_v42, 1  ;;  %v1670_v49 = vld [vmem:[%s1818_s4 + $0x18] sm:$0xff]  ;;  %v1674_v57 = vld [vmem:[%s1818_s4 + $0x60] sm:$0xff]  ;;  %v1479_v0 = vld [vmem:[%s1818_s4 + $0x68] sm:$0xf]  ;;  %v622_v6 = vunpack.c.l.b16 %v1489_v2 }
  0x19   : > { %v469_v34 = vor.u32 %v468_v32, %v464_v31  ;;  %v477_v43 = vor.u32 %v475_v41, %v473_v35  ;;  %v487_v51 = vshll.u32 %v1670_v49, 16  ;;  %v1662_v55 = vld [vmem:[%s1818_s4 + $0x18] sm:$0xff]  ;;  %v461_v60 = vpack.c.b16 %v456_v58, %v456_v58  ;;  %v238_v61 = vld [vmem:[%s1818_s4 + $0x20] sm:$0xf]  ;;  %v1679_v9 = vld [vmem:[%s1818_s4 + $0x48] sm:$0xff] }
  0x1a   : > { %v485_v52 = vor.u32 %v483_v50, %v481_v44  ;;  %v491_v62 = vshrl.u32 %v1670_v49, 16  ;;  %v344_v1 = vunpack.c.l.b16 %v238_v61  ;;  %v696_v5 = vunpack.c.l.b16 %v1479_v0  ;;  %v1680_v12 = vld [vmem:[%s1818_s4 + $0x50] sm:$0xff]  ;;  %v1692_v15 = vld [vmem:[%s1818_s4 + $0x98] sm:$0xff]  ;;  %v1693_v33 = vld [vmem:[%s1818_s4 + $0xa0] sm:$0xff] }
  0x1b   : > { %v474_v37 = vsel %vm462_vm2, %v469_v34, %v473_v35  ;;  %v482_v46 = vsel %vm462_vm2, %v477_v43, %v481_v44  ;;  %v489_v53 = vrot.slane %v487_v51, 1  ;;  %v495_v63 = vshll.u32 %v461_v60, 16  ;;  %v1691_v14 = vld [vmem:[%s1818_s4 + $0x90] sm:$0xff]  ;;  %v1681_v32 = vld [vmem:[%s1818_s4 + $0x58] sm:$0xff]  ;;  %v1685_v0 = vld [vmem:[%s1818_s4 + $0xa0] sm:$0xff] }
  0x1c   : > { %v349_v7 = vpack.c.b16 %v344_v1, %v344_v1  ;;  %v701_v10 = vpack.c.b16 %v696_v5, %v696_v5  ;;  %v627_v11 = vpack.c.b16 %v622_v6, %v622_v6  ;;  %v817_v13 = vshll.u32 %v1679_v9, 16  ;;  %v1683_v31 = vld [vmem:[%s1818_s4 + $0x90] sm:$0xff]  ;;  %v1688_v58 = vld [vmem:[%s1818_s4 + $0xbc] sm:$0xff] }
  0x1d   : > { %v490_v56 = vsel %vm462_vm2, %v485_v52, %v489_v53  ;;  %v493_v3 = vor.u32 %v491_v62, %v489_v53  ;;  %v497_v4 = vrot.slane %v495_v63, 1  ;;  %v1167_v16 = vshll.u32 %v1691_v14, 16  ;;  %v1687_v42 = vld [vmem:[%s1818_s4 + $0xb4] sm:$0xff]  ;;  %v1634_v1 = vld [vmem:[%s1818_s4 + $0xb0] sm:$0xf] }
  0x1e   : > { %v815_v17 = vshrl.u32 %v1679_v9, 16  ;;  %v819_v18 = vrot.slane %v817_v13, 1  ;;  %v822_v19 = vshll.u32 %v1680_v12, 16  ;;  %v1165_v20 = vshrl.u32 %v1691_v14, 16 }
  0x1f   : > { %v498_v8 = vsel %vm462_vm2, %v493_v3, %v497_v4  ;;  %v1169_v21 = vrot.slane %v1167_v16, 1  ;;  %v826_v34 = vshrl.u32 %v1680_v12, 16  ;;  %v830_v35 = vshll.u32 %v1681_v32, 16 }
  0x20   : > { %v824_v25 = vrot.slane %v822_v19, 1  ;;  %v1750_v43 = vmov 0.0   ;;  %v834_v49 = vshrl.u32 %v1681_v32, 16  ;;  %v1184_v51 = vshrl.u32 %v1693_v33, 16 }
  0x21   : > { %212 = vst.msk [vmem:[#allocation2] sm:$0xff] %vm211_vm1, %v1750_v43  ;;  %v1158_v3 = vunpack.c.l.b16 %v1634_v1 }
  0x22   : > { %213 = vst.msk [vmem:[#allocation2 + $0x8] sm:$0xff] %vm211_vm1, %v1750_v43 }
  0x23   : > { %214 = vst.msk [vmem:[#allocation2 + $0x10] sm:$0xff] %vm211_vm1, %v1750_v43  ;;  %v1163_v5 = vpack.c.b16 %v1158_v3, %v1158_v3 }
  0x24   : > { %1426 = vmatmul.msk.bf16.gmra.mxu2 %vm211_vm1, %v1666_v22  ;;  %1444 = vmatmul.msk.bf16.vlgmr.msrb.gmra.mxu1 %vm211_vm1, %v1659_v23  ;;  %v1172_v22 = vshll.u32 %v1692_v15, 16  ;;  %v499_v23 = vshrl.u32 %v461_v60, 16  ;;  %215 = vst.msk [vmem:[#allocation2 + $0x18] sm:$0xff] %vm211_vm1, %v1750_v43 }
  0x25   : > { %1528 = vmatmul.msk.bf16.vlgmr.msrb.gmra.mxu0 %vm211_vm1, %v1671_v24  ;;  %v820_v24 = vor.u32 %v819_v18, %v815_v17  ;;  %216 = vst.msk [vmem:[#allocation2 + $0x20] sm:$0xff] %vm211_vm1, %v1750_v43  ;;  %v1196_v12 = vshll.u32 %v1163_v5, 16  ;;  %v1689_v18 = vld [vmem:[%s1818_s4 + $0xc4] sm:$0xff] }
  0x26   : > { %1507 = vmatmul.msk.bf16.vlgmr.msrb.gmra.mxu3 %vm211_vm1, %v1675_v26  ;;  %v1170_v26 = vor.u32 %v1169_v21, %v1165_v20  ;;  %v1174_v27 = vrot.slane %v1172_v22, 1  ;;  %v501_v28 = vor.u32 %v499_v23, %v497_v4  ;;  %217 = vst.msk [vmem:[#allocation2 + $0x28] sm:$0xff] %vm211_vm1, %v1750_v43 }
  0x27   : > { %v825_v29 = vsel %vm462_vm2, %v820_v24, %v824_v25  ;;  %218 = vst.msk [vmem:[#allocation2 + $0x30] sm:$0xff] %vm211_vm1, %v1750_v43  ;;  %v1198_v16 = vrot.slane %v1196_v12, 1 }
  0x28   : > { %v1175_v30 = vsel %vm462_vm2, %v1170_v26, %v1174_v27  ;;  %219 = vst.msk [vmem:[#allocation2 + $0x38] sm:$0xff] %vm211_vm1, %v1750_v43  ;;  %v221_v19 = vld [vmem:[#allocation2] sm:$0xff]  ;;  %v1686_v26 = vld [vmem:[%s1818_s4 + $0xa8] sm:$0xff] }
  0x29   : > { %220 = vst.msk [vmem:[#allocation2 + $0x40] sm:$0xff] %vm211_vm1, %v1750_v43 }
  0x34   : > { %1445 = vmatmul.msk.bf16.gmra.mxu1 %vm211_vm1, %v1660_v36  ;;  %1466 = vmatmul.msk.bf16.vlgmr.msrb.gmra.mxu2 %vm211_vm1, %v474_v37  ;;  %v1176_v36 = vshrl.u32 %v1692_v15, 16  ;;  %v1180_v37 = vshll.u32 %v1693_v33, 16 }
  0x35   : > { %1529 = vmatmul.msk.bf16.gmra.mxu0 %vm211_vm1, %v1672_v38  ;;  %v828_v38 = vor.u32 %v826_v34, %v824_v25 }
  0x36   : > { %1508 = vmatmul.msk.bf16.gmra.mxu3 %vm211_vm1, %v1676_v39  ;;  %v832_v39 = vrot.slane %v830_v35, 1  ;;  %v1178_v40 = vor.u32 %v1176_v36, %v1174_v27  ;;  %v1182_v41 = vrot.slane %v1180_v37, 1  ;;  %v1572_v36 = vld [vmem:[%s1818_s4 + $0xb0] sm:$0xf]  ;;  %v1200_v37 = vshrl.u32 %v1163_v5, 16 }
  0x38   : > { %v833_v44 = vsel %vm462_vm2, %v828_v38, %v832_v39  ;;  %v836_v53 = vor.u32 %v834_v49, %v832_v39  ;;  %v1046_v39 = vunpack.c.l.b16 %v1572_v36 }
  0x44   : > { %1446 = vmatmul.msk.bf16.gmra.mxu1 %vm211_vm1, %v1661_v45  ;;  %1467 = vmatmul.msk.bf16.gmra.mxu2 %vm211_vm1, %v482_v46  ;;  %v1183_v45 = vsel %vm462_vm2, %v1178_v40, %v1182_v41  ;;  %v1684_v46 = vld [vmem:[%s1818_s4 + $0x98] sm:$0xff] }
  0x45   : > { %1530 = vmatmul.msk.bf16.gmra.mxu0 %vm211_vm1, %v1673_v47  ;;  %v1682_v47 = vld [vmem:[%s1818_s4 + $0x60] sm:$0xff] }
  0x46   : > { %1509 = vmatmul.msk.bf16.gmra.mxu3 %vm211_vm1, %v1677_v48  ;;  %v1694_v48 = vld [vmem:[%s1818_s4 + $0xa8] sm:$0xff]  ;;  %v838_v50 = vshll.u32 %v1682_v47, 16 }
  0x47   : > { %v1188_v52 = vshll.u32 %v1694_v48, 16 }
  0x48   : > { %v840_v54 = vrot.slane %v838_v50, 1 }
  0x4a   : > { %v841_v60 = vsel %vm462_vm2, %v836_v53, %v840_v54  ;;  %v224_v53 = vld [vmem:[#allocation2 + $0x18] sm:$0xff] }
  0x54   : > { %1447 = vmatmul.msk.bf16.gmra.mxu1 %vm211_vm1, %v1662_v55  ;;  %1468 = vmatmul.msk.bf16.gmra.mxu2 %vm211_vm1, %v490_v56  ;;  %v1541_v55 = vld [vmem:[%s1818_s4 + $0x68] sm:$0xf]  ;;  %v1186_v56 = vor.u32 %v1184_v51, %v1182_v41  ;;  %v1690_v41 = vld [vmem:[%s1818_s4 + $0xcc] sm:$0xff] }
  0x55   : > { %1531 = vmatmul.msk.bf16.gmra.mxu0 %vm211_vm1, %v1674_v57  ;;  %v1190_v57 = vrot.slane %v1188_v52, 1  ;;  %v808_v61 = vunpack.c.l.b16 %v1541_v55  ;;  %v1582_v55 = vld [vmem:[%s1818_s4 + $0xd4] sm:$0xf] }
  0x56   : > { %1510 = vmatmul.msk.bf16.gmra.mxu3 %vm211_vm1, %v1678_v59 }
  0x57   : > { %v1191_v63 = vsel %vm462_vm2, %v1186_v56, %v1190_v57  ;;  %v813_v2 = vpack.c.b16 %v808_v61, %v808_v61 }
  0x59   : > { %v850_v35 = vshrl.u32 %v813_v2, 16 }
  0x64   : > { %1448 = vmatmul.msk.bf16.gmra.mxu1 %vm211_vm1, %v349_v7  ;;  %1469 = vmatmul.msk.bf16.gmra.mxu2 %vm211_vm1, %v498_v8  ;;  %v842_v7 = vshrl.u32 %v1682_v47, 16  ;;  %v846_v8 = vshll.u32 %v813_v2, 16  ;;  %v225_v2 = vld [vmem:[#allocation2 + $0x20] sm:$0xff] }
  0x65   : > { %1532 = vmatmul.msk.bf16.gmra.mxu0 %vm211_vm1, %v701_v10 }
  0x66   : > { %1511 = vmatmul.msk.bf16.gmra.mxu3 %vm211_vm1, %v627_v11  ;;  %v1192_v11 = vshrl.u32 %v1694_v48, 16  ;;  %v844_v13 = vor.u32 %v842_v7, %v840_v54  ;;  %v848_v14 = vrot.slane %v846_v8, 1  ;;  %v1051_v48 = vpack.c.b16 %v1046_v39, %v1046_v39 }
  0x68   : > { %v1194_v15 = vor.u32 %v1192_v11, %v1190_v57  ;;  %v849_v21 = vsel %vm462_vm2, %v844_v13, %v848_v14  ;;  %v852_v40 = vor.u32 %v850_v35, %v848_v14 }
  0x6a   : > { %v1199_v25 = vsel %vm462_vm2, %v1194_v15, %v1198_v16 }
  0x74   : > { %1470 = vmatmul.msk.bf16.gmra.mxu2 %vm211_vm1, %v501_v28  ;;  %1559 = vmatmul.msk.bf16.vlgmr.msra.gmra.mxu1 %vm211_vm1, %v825_v29  ;;  %v222_v29 = vld [vmem:[#allocation2 + $0x8] sm:$0xff] }
  0x75   : > { %1652 = vmatmul.msk.bf16.vlgmr.msra.gmra.mxu0 %vm211_vm1, %v1175_v30 }
  0x76   : > { %1621 = vmatmul.msk.bf16.vlgmr.msra.gmra.mxu3 %vm211_vm1, %v1683_v31 }
  0x84   : > { %1560 = vmatmul.msk.bf16.gmra.mxu1 %vm211_vm1, %v833_v44  ;;  %1600 = vmatmul.msk.bf16.vlgmr.msra.gmra.mxu2 %vm211_vm1, %v1687_v42  ;;  %v223_v42 = vld [vmem:[#allocation2 + $0x10] sm:$0xff]  ;;  %v1202_v44 = vor.u32 %v1200_v37, %v1198_v16  ;;  %v226_v16 = vld [vmem:[#allocation2 + $0x28] sm:$0xff] }
  0x85   : > { %1653 = vmatmul.msk.bf16.gmra.mxu0 %vm211_vm1, %v1183_v45 }
  0x86   : > { %1622 = vmatmul.msk.bf16.gmra.mxu3 %vm211_vm1, %v1684_v46 }
  0x91   : > { %v308_v59 = vpop.f32.mrf.mxu1 }
  0x92   : > { %v303_v62 = vpop.f32.mrf.mxu0 }
  0x94   : > { %1561 = vmatmul.msk.bf16.gmra.mxu1 %vm211_vm1, %v841_v60  ;;  %1601 = vmatmul.msk.bf16.gmra.mxu2 %vm211_vm1, %v1688_v58  ;;  %v972_v60 = vunpack.c.l.b16 %v1582_v55 }
  0x95   : > { %1654 = vmatmul.msk.bf16.gmra.mxu0 %vm211_vm1, %v1191_v63 }
  0x96   : > { %1623 = vmatmul.msk.bf16.gmra.mxu3 %vm211_vm1, %v1685_v0  ;;  %v977_v1 = vpack.c.b16 %v972_v60, %v972_v60 }
  0x97   : > { %v1927_v4 = vpop.f32.mrf.mxu2 }
  0x99   : > { %v310_v6 = vpop.f32.mrf.mxu1  ;;  %v1930_v9 = vpop.f32.mrf.mxu3 }
  0x9a   : > { %v305_v10 = vpop.f32.mrf.mxu0 }
  0x9f   : > { %v1932_v17 = vpop.f32.mrf.mxu2 }
  0xa1   : > { %v377_v20 = vpop.f32.mrf.mxu1  ;;  %v325_v23 = vpop.f32.mrf.mxu3 }
  0xa2   : > { %v378_v22 = vadd.f32 %v377_v20, %v303_v62  ;;  %v729_v24 = vpop.f32.mrf.mxu0 }
  0xa4   : > { %v401_v27 = vadd.f32 %v378_v22, %v221_v19  ;;  %1562 = vmatmul.msk.bf16.gmra.mxu1 %vm211_vm1, %v849_v21  ;;  %1602 = vmatmul.msk.bf16.gmra.mxu2 %vm211_vm1, %v1689_v18 }
  0xa5   : > { %1655 = vmatmul.msk.bf16.gmra.mxu0 %vm211_vm1, %v1199_v25 }
  0xa6   : > { %410 = vst.msk [vmem:[#allocation2] sm:$0xff] %vm211_vm1, %v401_v27  ;;  %1624 = vmatmul.msk.bf16.gmra.mxu3 %vm211_vm1, %v1686_v26 }
  0xa7   : > { %v1942_v28 = vpop.f32.mrf.mxu2 }
  0xa9   : > { %v379_v30 = vpop.f32.mrf.mxu1  ;;  %v655_v32 = vpop.f32.mrf.mxu3 }
  0xaa   : > { %v380_v31 = vadd.f32 %v379_v30, %v305_v10  ;;  %v731_v33 = vpop.f32.mrf.mxu0  ;;  %v730_v63 = vadd.f32 %v729_v24, %v655_v32 }
  0xac   : > { %v402_v34 = vadd.f32 %v380_v31, %v222_v29  ;;  %v227_v29 = vld [vmem:[#allocation2 + $0x30] sm:$0xff] }
  0xad   : > { %v419_v50 = vld [vmem:[#allocation2] sm:$0xff] }
  0xae   : > { %411 = vst.msk [vmem:[#allocation2 + $0x8] sm:$0xff] %vm211_vm1, %v402_v34 }
  0xaf   : > { %v1947_v38 = vpop.f32.mrf.mxu2 }
  0xb1   : > { %v382_v43 = vpop.f32.mrf.mxu1  ;;  %v657_v46 = vpop.f32.mrf.mxu3 }
  0xb2   : > { %v383_v45 = vadd.f32 %v382_v43, %v308_v59  ;;  %v734_v47 = vpop.f32.mrf.mxu0  ;;  %v732_v14 = vadd.f32 %v731_v33, %v657_v46 }
  0xb4   : > { %v403_v49 = vadd.f32 %v383_v45, %v223_v42  ;;  %1563 = vmatmul.msk.bf16.gmra.mxu1 %vm211_vm1, %v852_v40  ;;  %1603 = vmatmul.msk.bf16.gmra.mxu2 %vm211_vm1, %v1690_v41  ;;  %v228_v41 = vld [vmem:[#allocation2 + $0x38] sm:$0xff] }
  0xb5   : > { %1656 = vmatmul.msk.bf16.gmra.mxu0 %vm211_vm1, %v1202_v44  ;;  %v420_v61 = vld [vmem:[#allocation2 + $0x8] sm:$0xff] }
  0xb6   : > { %412 = vst.msk [vmem:[#allocation2 + $0x10] sm:$0xff] %vm211_vm1, %v403_v49  ;;  %1625 = vmatmul.msk.bf16.gmra.mxu3 %vm211_vm1, %v1051_v48 }
  0xb7   : > { %v529_v51 = vpop.f32.mrf.mxu2 }
  0xb8   : > { %v553_v52 = vadd.f32 %v529_v51, %v419_v50 }
  0xb9   : > { %v384_v54 = vpop.f32.mrf.mxu1  ;;  %v660_v57 = vpop.f32.mrf.mxu3 }
  0xba   : > { %562 = vst.msk [vmem:[#allocation2] sm:$0xff] %vm211_vm1, %v553_v52  ;;  %v385_v56 = vadd.f32 %v384_v54, %v310_v6  ;;  %v736_v58 = vpop.f32.mrf.mxu0  ;;  %v735_v26 = vadd.f32 %v734_v47, %v660_v57  ;;  %v229_v52 = vld [vmem:[#allocation2 + $0x40] sm:$0xff] }
  0xbc   : > { %v404_v59 = vadd.f32 %v385_v56, %v224_v53 }
  0xbd   : > { %v421_v12 = vld [vmem:[#allocation2 + $0x10] sm:$0xff] }
  0xbe   : > { %413 = vst.msk [vmem:[#allocation2 + $0x18] sm:$0xff] %vm211_vm1, %v404_v59 }
  0xbf   : > { %v531_v62 = vpop.f32.mrf.mxu2 }
  0xc0   : > { %v554_v0 = vadd.f32 %v531_v62, %v420_v61 }
  0xc1   : > { %v387_v3 = vpop.f32.mrf.mxu1  ;;  %v572_v5 = vld [vmem:[#allocation2] sm:$0xff]  ;;  %v662_v8 = vpop.f32.mrf.mxu3 }
  0xc2   : > { %563 = vst.msk [vmem:[#allocation2 + $0x8] sm:$0xff] %vm211_vm1, %v554_v0  ;;  %v388_v7 = vadd.f32 %v387_v3, %v1927_v4  ;;  %v739_v6 = vpop.f32.mrf.mxu0  ;;  %v753_v10 = vadd.f32 %v730_v63, %v572_v5  ;;  %v737_v39 = vadd.f32 %v736_v58, %v662_v8 }
  0xc4   : > { %v405_v11 = vadd.f32 %v388_v7, %v225_v2  ;;  %1604 = vmatmul.msk.bf16.gmra.mxu2 %vm211_vm1, %v977_v1  ;;  %762 = vst.msk [vmem:[#allocation2] sm:$0xff] %vm211_vm1, %v753_v10 }
  0xc5   : > { %v422_v24 = vld [vmem:[#allocation2 + $0x18] sm:$0xff] }
  0xc6   : > { %414 = vst.msk [vmem:[#allocation2 + $0x20] sm:$0xff] %vm211_vm1, %v405_v11 }
  0xc7   : > { %v534_v13 = vpop.f32.mrf.mxu2 }
  0xc8   : > { %v555_v15 = vadd.f32 %v534_v13, %v421_v12 }
  0xc9   : > { %v389_v18 = vpop.f32.mrf.mxu1  ;;  %v573_v19 = vld [vmem:[#allocation2 + $0x8] sm:$0xff]  ;;  %v665_v20 = vpop.f32.mrf.mxu3 }
  0xca   : > { %564 = vst.msk [vmem:[#allocation2 + $0x10] sm:$0xff] %vm211_vm1, %v555_v15  ;;  %v390_v4 = vadd.f32 %v389_v18, %v1932_v17  ;;  %v741_v21 = vpop.f32.mrf.mxu0  ;;  %v754_v22 = vadd.f32 %v732_v14, %v573_v19  ;;  %v740_v50 = vadd.f32 %v739_v6, %v665_v20 }
  0xcb   : > { %v771_v6 = vld [vmem:[#allocation2] sm:$0xff] }
  0xcc   : > { %v406_v23 = vadd.f32 %v390_v4, %v226_v16  ;;  %763 = vst.msk [vmem:[#allocation2 + $0x8] sm:$0xff] %vm211_vm1, %v754_v22 }
  0xcd   : > { %v423_v36 = vld [vmem:[#allocation2 + $0x20] sm:$0xff] }
  0xce   : > { %415 = vst.msk [vmem:[#allocation2 + $0x28] sm:$0xff] %vm211_vm1, %v406_v23 }
  0xcf   : > { %v536_v25 = vpop.f32.mrf.mxu2 }
  0xd0   : > { %v556_v27 = vadd.f32 %v536_v25, %v422_v24 }
  0xd1   : > { %v392_v30 = vpop.f32.mrf.mxu1  ;;  %v574_v31 = vld [vmem:[#allocation2 + $0x10] sm:$0xff]  ;;  %v667_v17 = vpop.f32.mrf.mxu3 }
  0xd2   : > { %565 = vst.msk [vmem:[#allocation2 + $0x18] sm:$0xff] %vm211_vm1, %v556_v27  ;;  %v393_v32 = vadd.f32 %v392_v30, %v1942_v28  ;;  %v744_v33 = vpop.f32.mrf.mxu0  ;;  %v755_v34 = vadd.f32 %v735_v26, %v574_v31  ;;  %v742_v61 = vadd.f32 %v741_v21, %v667_v17 }
  0xd3   : > { %v772_v20 = vld [vmem:[#allocation2 + $0x8] sm:$0xff] }
  0xd4   : > { %v407_v35 = vadd.f32 %v393_v32, %v227_v29  ;;  %764 = vst.msk [vmem:[#allocation2 + $0x10] sm:$0xff] %vm211_vm1, %v755_v34 }
  0xd5   : > { %v424_v48 = vld [vmem:[#allocation2 + $0x28] sm:$0xff] }
  0xd6   : > { %416 = vst.msk [vmem:[#allocation2 + $0x30] sm:$0xff] %vm211_vm1, %v407_v35 }
  0xd7   : > { %v539_v37 = vpop.f32.mrf.mxu2 }
  0xd8   : > { %v557_v40 = vadd.f32 %v539_v37, %v423_v36 }
  0xd9   : > { %v394_v42 = vpop.f32.mrf.mxu1  ;;  %v575_v43 = vld [vmem:[#allocation2 + $0x18] sm:$0xff]  ;;  %v670_v28 = vpop.f32.mrf.mxu3 }
  0xda   : > { %566 = vst.msk [vmem:[#allocation2 + $0x20] sm:$0xff] %vm211_vm1, %v557_v40  ;;  %v395_v44 = vadd.f32 %v394_v42, %v1947_v38  ;;  %v746_v45 = vpop.f32.mrf.mxu0  ;;  %v756_v46 = vadd.f32 %v737_v39, %v575_v43  ;;  %v745_v7 = vadd.f32 %v744_v33, %v670_v28 }
  0xdb   : > { %v773_v31 = vld [vmem:[#allocation2 + $0x10] sm:$0xff] }
  0xdc   : > { %v408_v47 = vadd.f32 %v395_v44, %v228_v41  ;;  %765 = vst.msk [vmem:[#allocation2 + $0x18] sm:$0xff] %vm211_vm1, %v756_v46 }
  0xdd   : > { %v425_v59 = vld [vmem:[#allocation2 + $0x30] sm:$0xff] }
  0xde   : > { %417 = vst.msk [vmem:[#allocation2 + $0x38] sm:$0xff] %vm211_vm1, %v408_v47 }
  0xdf   : > { %v541_v49 = vpop.f32.mrf.mxu2 }
  0xe0   : > { %v558_v51 = vadd.f32 %v541_v49, %v424_v48 }
  0xe1   : > { %v397_v53 = vpop.f32.mrf.mxu1  ;;  %v576_v54 = vld [vmem:[#allocation2 + $0x20] sm:$0xff]  ;;  %v672_v38 = vpop.f32.mrf.mxu3 }
  0xe2   : > { %567 = vst.msk [vmem:[#allocation2 + $0x28] sm:$0xff] %vm211_vm1, %v558_v51  ;;  %v398_v55 = vadd.f32 %v397_v53, %v1930_v9  ;;  %v749_v56 = vpop.f32.mrf.mxu0  ;;  %v757_v57 = vadd.f32 %v740_v50, %v576_v54  ;;  %v747_v19 = vadd.f32 %v746_v45, %v672_v38 }
  0xe3   : > { %v774_v40 = vld [vmem:[#allocation2 + $0x18] sm:$0xff] }
  0xe4   : > { %v409_v58 = vadd.f32 %v398_v55, %v229_v52  ;;  %766 = vst.msk [vmem:[#allocation2 + $0x20] sm:$0xff] %vm211_vm1, %v757_v57 }
  0xe5   : > { %v426_v9 = vld [vmem:[#allocation2 + $0x38] sm:$0xff] }
  0xe6   : > { %418 = vst.msk [vmem:[#allocation2 + $0x40] sm:$0xff] %vm211_vm1, %v409_v58 }
  0xe7   : > { %v544_v60 = vpop.f32.mrf.mxu2 }
  0xe8   : > { %v559_v62 = vadd.f32 %v544_v60, %v425_v59  ;;  %v2002_v60 = vld [vmem:[%s2074_s2] ss:$0 sm:$0xff] }
  0xe9   : > { %v399_v63 = vpop.f32.mrf.mxu1  ;;  %v577_v0 = vld [vmem:[#allocation2 + $0x28] sm:$0xff]  ;;  %v675_v1 = vpop.f32.mrf.mxu3 }
  0xea   : > { %568 = vst.msk [vmem:[#allocation2 + $0x30] sm:$0xff] %vm211_vm1, %v559_v62  ;;  %v751_v2 = vpop.f32.mrf.mxu0  ;;  %v758_v3 = vadd.f32 %v742_v61, %v577_v0  ;;  %v750_v29 = vadd.f32 %v749_v56, %v675_v1 }
  0xeb   : > { %v775_v48 = vld [vmem:[#allocation2 + $0x20] sm:$0xff] }
  0xec   : > { %767 = vst.msk [vmem:[#allocation2 + $0x28] sm:$0xff] %vm211_vm1, %v758_v3 }
  0xed   : > { %v427_v16 = vld [vmem:[#allocation2 + $0x40] sm:$0x7f] }
  0xef   : > { %v546_v5 = vpop.f32.mrf.mxu2 }
  0xf0   : > { %v560_v8 = vadd.f32 %v546_v5, %v426_v9 }
  0xf1   : > { %v880_v10 = vpop.f32.mrf.mxu1  ;;  %v578_v11 = vld [vmem:[#allocation2 + $0x30] sm:$0xff]  ;;  %v677_v13 = vpop.f32.mrf.mxu3 }
  0xf2   : > { %569 = vst.msk [vmem:[#allocation2 + $0x38] sm:$0xff] %vm211_vm1, %v560_v8  ;;  %v904_v12 = vadd.f32 %v880_v10, %v771_v6  ;;  %v1230_v14 = vpop.f32.mrf.mxu0  ;;  %v759_v15 = vadd.f32 %v745_v7, %v578_v11 }
  0xf3   : > { %v776_v58 = vld [vmem:[#allocation2 + $0x28] sm:$0xff] }
  0xf4   : > { %913 = vst.msk [vmem:[#allocation2] sm:$0xff] %vm211_vm1, %v904_v12 }
  0xf5   : > { %768 = vst.msk [vmem:[#allocation2 + $0x30] sm:$0xff] %vm211_vm1, %v759_v15 }
  0xf7   : > { %v549_v18 = vpop.f32.mrf.mxu2 }
  0xf8   : > { %v561_v4 = vadd.f32 %v549_v18, %v427_v16 }
  0xf9   : > { %v882_v21 = vpop.f32.mrf.mxu1  ;;  %v579_v22 = vld [vmem:[#allocation2 + $0x38] sm:$0xff]  ;;  %v1079_v24 = vpop.f32.mrf.mxu3 }
  0xfa   : > { %571 = vst.msk [vmem:[#allocation2 + $0x40] sm:$0x7f] %vm570_vm3, %v561_v4  ;;  %v905_v23 = vadd.f32 %v882_v21, %v772_v20  ;;  %v1232_v25 = vpop.f32.mrf.mxu0  ;;  %v760_v26 = vadd.f32 %v747_v19, %v579_v22 }
  0xfb   : > { %v922_v39 = vld [vmem:[#allocation2] sm:$0xff] }
  0xfc   : > { %914 = vst.msk [vmem:[#allocation2 + $0x8] sm:$0xff] %vm211_vm1, %v905_v23  ;;  %v777_v6 = vld [vmem:[#allocation2 + $0x30] sm:$0xff] }
  0xfd   : > { %769 = vst.msk [vmem:[#allocation2 + $0x38] sm:$0xff] %vm211_vm1, %v760_v26 }
  0xff   : > { %v551_v27 = vpop.f32.mrf.mxu2 }
 0x101   : > { %v580_v30 = vld [vmem:[#allocation2 + $0x40] sm:$0xff]  ;;  %v885_v32 = vpop.f32.mrf.mxu1  ;;  %v1081_v34 = vpop.f32.mrf.mxu3 }
 0x102   : > { %v761_v17 = vadd.f32 %v750_v29, %v580_v30  ;;  %v906_v33 = vadd.f32 %v885_v32, %v773_v31  ;;  %v1235_v35 = vpop.f32.mrf.mxu0 }
 0x103   : > { %v923_v47 = vld [vmem:[#allocation2 + $0x8] sm:$0xff] }
 0x104   : > { %770 = vst.msk [vmem:[#allocation2 + $0x40] sm:$0xff] %vm211_vm1, %v761_v17  ;;  %v778_v22 = vld [vmem:[#allocation2 + $0x38] sm:$0xff] }
 0x105   : > { %915 = vst.msk [vmem:[#allocation2 + $0x10] sm:$0xff] %vm211_vm1, %v906_v33 }
 0x107   : > { %v1005_v36 = vpop.f32.mrf.mxu2 }
 0x108   : > { %v1080_v37 = vadd.f32 %v1079_v24, %v1005_v36 }
 0x109   : > { %v887_v41 = vpop.f32.mrf.mxu1  ;;  %v1084_v44 = vpop.f32.mrf.mxu3 }
 0x10a   : > { %v1103_v42 = vadd.f32 %v1080_v37, %v922_v39  ;;  %v907_v43 = vadd.f32 %v887_v41, %v774_v40  ;;  %v1989_v28 = vpop.f32.mrf.mxu0 }
 0x10c   : > { %1112 = vst.msk [vmem:[#allocation2] sm:$0xff] %vm211_vm1, %v1103_v42  ;;  %v924_v57 = vld [vmem:[#allocation2 + $0x10] sm:$0xff] }
 0x10d   : > { %916 = vst.msk [vmem:[#allocation2 + $0x18] sm:$0xff] %vm211_vm1, %v907_v43 }
 0x10f   : > { %v1007_v45 = vpop.f32.mrf.mxu2 }
 0x110   : > { %v1082_v46 = vadd.f32 %v1081_v34, %v1007_v45 }
 0x111   : > { %v890_v49 = vpop.f32.mrf.mxu1  ;;  %v1086_v52 = vpop.f32.mrf.mxu3 }
 0x112   : > { %v1104_v50 = vadd.f32 %v1082_v46, %v923_v47  ;;  %v908_v51 = vadd.f32 %v890_v49, %v775_v48  ;;  %v1993_v53 = vpop.f32.mrf.mxu0 }
 0x113   : > { %v1121_v54 = vld [vmem:[#allocation2] sm:$0xff] }
 0x114   : > { %v1254_v55 = vadd.f32 %v1230_v14, %v1121_v54  ;;  %1113 = vst.msk [vmem:[#allocation2 + $0x8] sm:$0xff] %vm211_vm1, %v1104_v50  ;;  %v925_v8 = vld [vmem:[#allocation2 + $0x18] sm:$0xff] }
 0x115   : > { %917 = vst.msk [vmem:[#allocation2 + $0x20] sm:$0xff] %vm211_vm1, %v908_v51 }
 0x116   : > { %1263 = vst.msk [vmem:[#allocation2] sm:$0xff] %vm211_vm1, %v1254_v55 }
 0x117   : > { %v1010_v38 = vpop.f32.mrf.mxu2 }
 0x118   : > { %v1085_v56 = vadd.f32 %v1084_v44, %v1010_v38 }
 0x119   : > { %v892_v59 = vpop.f32.mrf.mxu1  ;;  %v1089_v63 = vpop.f32.mrf.mxu3 }
 0x11a   : > { %v1105_v61 = vadd.f32 %v1085_v56, %v924_v57  ;;  %v909_v62 = vadd.f32 %v892_v59, %v776_v58  ;;  %v2004_v0 = vpop.f32.mrf.mxu0 }
 0x11b   : > { %v1122_v1 = vld [vmem:[#allocation2 + $0x8] sm:$0xff] }
 0x11c   : > { %v1255_v2 = vadd.f32 %v1232_v25, %v1122_v1  ;;  %1114 = vst.msk [vmem:[#allocation2 + $0x10] sm:$0xff] %vm211_vm1, %v1105_v61  ;;  %v926_v21 = vld [vmem:[#allocation2 + $0x20] sm:$0xff] }
 0x11d   : > { %v1272_v3 = vld [vmem:[#allocation2] sm:$0xff]  ;;  %918 = vst.msk [vmem:[#allocation2 + $0x28] sm:$0xff] %vm211_vm1, %v909_v62 }
 0x11e   : > { %v1285_v9 = vadd.f32 %v2002_v60, %v1272_v3  ;;  %1264 = vst.msk [vmem:[#allocation2 + $0x8] sm:$0xff] %vm211_vm1, %v1255_v2 }
 0x11f   : > { %v1012_v5 = vpop.f32.mrf.mxu2 }
 0x120   : > { %1294 = vst.msk [vmem:[%s2010_s12] sm:$0xff] %vm211_vm1, %v1285_v9  ;;  %v1087_v7 = vadd.f32 %v1086_v52, %v1012_v5 }
 0x121   : > { %v895_v10 = vpop.f32.mrf.mxu1  ;;  %v1091_v13 = vpop.f32.mrf.mxu3 }
 0x122   : > { %v1106_v11 = vadd.f32 %v1087_v7, %v925_v8  ;;  %v910_v12 = vadd.f32 %v895_v10, %v777_v6  ;;  %v2017_v14 = vpop.f32.mrf.mxu0 }
 0x123   : > { %v1123_v15 = vld [vmem:[#allocation2 + $0x10] sm:$0xff] }
 0x124   : > { %v1256_v16 = vadd.f32 %v1235_v35, %v1123_v15  ;;  %1115 = vst.msk [vmem:[#allocation2 + $0x18] sm:$0xff] %vm211_vm1, %v1106_v11  ;;  %v927_v34 = vld [vmem:[#allocation2 + $0x28] sm:$0xff]  ;;  %v779_v35 = vld [vmem:[#allocation2 + $0x40] sm:$0x7f] }
 0x125   : > { %v1273_v18 = vld [vmem:[#allocation2 + $0x8] sm:$0xff]  ;;  %919 = vst.msk [vmem:[#allocation2 + $0x30] sm:$0xff] %vm211_vm1, %v910_v12 }
 0x126   : > { %v1286_v19 = vadd.f32 %v2002_v60, %v1273_v18  ;;  %1265 = vst.msk [vmem:[#allocation2 + $0x10] sm:$0xff] %vm211_vm1, %v1256_v16 }
 0x127   : > { %v1015_v4 = vpop.f32.mrf.mxu2 }
 0x128   : > { %1295 = vst.msk [vmem:[%s2010_s12 + $0x8] sm:$0xff] %vm211_vm1, %v1286_v19  ;;  %v1090_v20 = vadd.f32 %v1089_v63, %v1015_v4 }
 0x129   : > { %v897_v23 = vpop.f32.mrf.mxu1  ;;  %v1094_v26 = vpop.f32.mrf.mxu3 }
 0x12a   : > { %v1107_v24 = vadd.f32 %v1090_v20, %v926_v21  ;;  %v911_v25 = vadd.f32 %v897_v23, %v778_v22  ;;  %v1247_v27 = vpop.f32.mrf.mxu0 }
 0x12b   : > { %v1124_v29 = vld [vmem:[#allocation2 + $0x18] sm:$0xff] }
 0x12c   : > { %v1257_v30 = vadd.f32 %v1989_v28, %v1124_v29  ;;  %1116 = vst.msk [vmem:[#allocation2 + $0x20] sm:$0xff] %vm211_vm1, %v1107_v24  ;;  %v928_v47 = vld [vmem:[#allocation2 + $0x30] sm:$0xff] }
 0x12d   : > { %v1274_v31 = vld [vmem:[#allocation2 + $0x10] sm:$0xff]  ;;  %920 = vst.msk [vmem:[#allocation2 + $0x38] sm:$0xff] %vm211_vm1, %v911_v25 }
 0x12e   : > { %v1287_v32 = vadd.f32 %v2002_v60, %v1274_v31  ;;  %1266 = vst.msk [vmem:[#allocation2 + $0x18] sm:$0xff] %vm211_vm1, %v1257_v30 }
 0x12f   : > { %v1017_v17 = vpop.f32.mrf.mxu2 }
 0x130   : > { %1296 = vst.msk [vmem:[%s2010_s12 + $0x10] sm:$0xff] %vm211_vm1, %v1287_v32  ;;  %v1092_v33 = vadd.f32 %v1091_v13, %v1017_v17 }
 0x131   : > { %v900_v36 = vpop.f32.mrf.mxu1  ;;  %v1096_v40 = vpop.f32.mrf.mxu3 }
 0x132   : > { %v1108_v37 = vadd.f32 %v1092_v33, %v927_v34  ;;  %v912_v39 = vadd.f32 %v900_v36, %v779_v35  ;;  %v1250_v41 = vpop.f32.mrf.mxu0 }
 0x133   : > { %v1125_v42 = vld [vmem:[#allocation2 + $0x20] sm:$0xff] }
 0x134   : > { %v1258_v43 = vadd.f32 %v1993_v53, %v1125_v42  ;;  %1117 = vst.msk [vmem:[#allocation2 + $0x28] sm:$0xff] %vm211_vm1, %v1108_v37  ;;  %v929_v57 = vld [vmem:[#allocation2 + $0x38] sm:$0xff] }
 0x135   : > { %v1275_v44 = vld [vmem:[#allocation2 + $0x18] sm:$0xff]  ;;  %921 = vst.msk [vmem:[#allocation2 + $0x40] sm:$0x7f] %vm570_vm3, %v912_v39 }
 0x136   : > { %v1288_v28 = vadd.f32 %v2002_v60, %v1275_v44  ;;  %1267 = vst.msk [vmem:[#allocation2 + $0x20] sm:$0xff] %vm211_vm1, %v1258_v43 }
 0x137   : > { %v1020_v45 = vpop.f32.mrf.mxu2 }
 0x138   : > { %1297 = vst.msk [vmem:[%s2010_s12 + $0x18] sm:$0xff] %vm211_vm1, %v1288_v28  ;;  %v1095_v46 = vadd.f32 %v1094_v26, %v1020_v45 }
 0x139   : > { %v902_v48 = vpop.f32.mrf.mxu1  ;;  %v1099_v50 = vpop.f32.mrf.mxu3 }
 0x13a   : > { %v1109_v49 = vadd.f32 %v1095_v46, %v928_v47  ;;  %v1252_v51 = vpop.f32.mrf.mxu0 }
 0x13b   : > { %v1126_v52 = vld [vmem:[#allocation2 + $0x28] sm:$0xff] }
 0x13c   : > { %v1259_v53 = vadd.f32 %v2004_v0, %v1126_v52  ;;  %1118 = vst.msk [vmem:[#allocation2 + $0x30] sm:$0xff] %vm211_vm1, %v1109_v49  ;;  %v930_v3 = vld [vmem:[#allocation2 + $0x40] sm:$0xff] }
 0x13d   : > { %v1276_v54 = vld [vmem:[#allocation2 + $0x20] sm:$0xff] }
 0x13e   : > { %v1289_v55 = vadd.f32 %v2002_v60, %v1276_v54  ;;  %1268 = vst.msk [vmem:[#allocation2 + $0x28] sm:$0xff] %vm211_vm1, %v1259_v53 }
 0x13f   : > { %v1022_v38 = vpop.f32.mrf.mxu2 }
 0x140   : > { %1298 = vst.msk [vmem:[%s2010_s12 + $0x20] sm:$0xff] %vm211_vm1, %v1289_v55  ;;  %v1097_v56 = vadd.f32 %v1096_v40, %v1022_v38 }
 0x141   : > { %v1101_v59 = vpop.f32.mrf.mxu3 }
 0x142   : > { %v1110_v58 = vadd.f32 %v1097_v56, %v929_v57 }
 0x143   : > { %v1127_v61 = vld [vmem:[#allocation2 + $0x30] sm:$0xff] }
 0x144   : > { %v1260_v62 = vadd.f32 %v2017_v14, %v1127_v61  ;;  %1119 = vst.msk [vmem:[#allocation2 + $0x38] sm:$0xff] %vm211_vm1, %v1110_v58 }
 0x145   : > { %v1277_v63 = vld [vmem:[#allocation2 + $0x28] sm:$0xff] }
 0x146   : > { %v1290_v0 = vadd.f32 %v2002_v60, %v1277_v63  ;;  %1269 = vst.msk [vmem:[#allocation2 + $0x30] sm:$0xff] %vm211_vm1, %v1260_v62 }
 0x147   : > { %v1025_v1 = vpop.f32.mrf.mxu2 }
 0x148   : > { %1299 = vst.msk [vmem:[%s2010_s12 + $0x28] sm:$0xff] %vm211_vm1, %v1290_v0  ;;  %v1100_v2 = vadd.f32 %v1099_v50, %v1025_v1 }
 0x14a   : > { %v1111_v9 = vadd.f32 %v1100_v2, %v930_v3 }
 0x14b   : > { %v1128_v5 = vld [vmem:[#allocation2 + $0x38] sm:$0xff] }
 0x14c   : > { %v1261_v7 = vadd.f32 %v1247_v27, %v1128_v5  ;;  %1120 = vst.msk [vmem:[#allocation2 + $0x40] sm:$0xff] %vm211_vm1, %v1111_v9 }
 0x14d   : > { %v1278_v8 = vld [vmem:[#allocation2 + $0x30] sm:$0xff] }
 0x14e   : > { %v1291_v6 = vadd.f32 %v2002_v60, %v1278_v8  ;;  %1270 = vst.msk [vmem:[#allocation2 + $0x38] sm:$0xff] %vm211_vm1, %v1261_v7 }
 0x14f   : > { %v1027_v10 = vpop.f32.mrf.mxu2 }
 0x150   : > { %1300 = vst.msk [vmem:[%s2010_s12 + $0x30] sm:$0xff] %vm211_vm1, %v1291_v6 }
 0x153   : > { %v1129_v11 = vld [vmem:[#allocation2 + $0x40] sm:$0x7f] }
 0x154   : > { %v1262_v12 = vadd.f32 %v1250_v41, %v1129_v11 }
 0x155   : > { %v1279_v13 = vld [vmem:[#allocation2 + $0x38] sm:$0xff] }
 0x156   : > { %v1292_v14 = vadd.f32 %v2002_v60, %v1279_v13  ;;  %1271 = vst.msk [vmem:[#allocation2 + $0x40] sm:$0x7f] %vm570_vm3, %v1262_v12 }
 0x158   : > { %1301 = vst.msk [vmem:[%s2010_s12 + $0x38] sm:$0xff] %vm211_vm1, %v1292_v14 }
 0x15d   : > { %v1280_v15 = vld [vmem:[#allocation2 + $0x40] sm:$0xff] }
 0x15e   : > { %v1293_v16 = vadd.f32 %v2002_v60, %v1280_v15 }
 0x160   : > { %1302 = vst.msk [vmem:[%s2010_s12 + $0x40] sm:$0xff] %vm211_vm1, %v1293_v16 }
 0x161 PF: > { %s13_s14 = sadd.s32 1, %s1748_s14   ;;  %s2076_s12 = smov %s1744_s13 }
 0x162   : > { %p10_p5 = scmp.ge.s32.totalorder %s13_s14, 4   ;;  %s2077_s13 = smov %s2079_s15 }
 0x164   :  { %12 = sbr.rel (!%p10_p5) target bundleno = 2 (0x2), region = 75 }

</bundles_post_ra>
